<compile_context>
chip_gen: v7x
topology: tpu7x:2x2x1
jax: 0.10.0
libtpu: 0.0.40
codegen_flags: <defaults>
</compile_context>

<pallas_src>
import functools

import jax
import jax.numpy as jnp
from jax.experimental import pallas as pl
from jax.experimental.pallas import tpu as pltpu

EPS = 1e-5                    # nn.InstanceNorm1d default eps
INV_SQRT2 = 0.7071067811865476


# ----------------------------- Pallas kernel --------------------------------
def _tree_encoder_kernel(*refs, nhead, has_mask):
    """One grid step processes a (Bt, S, D) slab; all weights resident in VMEM."""
    if has_mask:
        (src_ref, pos_ref, mask_ref,
         wqk_ref, bqk_ref, wv_ref, bv_ref, wo_ref, bo_ref,
         w1_ref, b1_ref, w2_ref, b2_ref, out_ref) = refs
    else:
        (src_ref, pos_ref,
         wqk_ref, bqk_ref, wv_ref, bv_ref, wo_ref, bo_ref,
         w1_ref, b1_ref, w2_ref, b2_ref, out_ref) = refs
        mask_ref = None

    src = src_ref[...]                          # (Bt, S, D)
    pos = pos_ref[...]                          # (Bt, S, D)
    Bt, S, D = src.shape
    hd = D // nhead
    R = Bt * S

    src_rows = src.reshape(R, D)                # leading-dim merge (minor dims untouched)
    qk_rows = src_rows + pos.reshape(R, D)      # role embedding feeds Q/K only; V uses raw src

    # ---- projections: two full-width matmuls over all Bt*S rows ----
    # wqk columns are [Q (scaled) | K]; scale 1/sqrt(hd) folded on the host.
    qk = jnp.dot(qk_rows, wqk_ref[...], preferred_element_type=jnp.float32) + bqk_ref[...]
    v_rows = jnp.dot(src_rows, wv_ref[...], preferred_element_type=jnp.float32) + bv_ref[...]

    mask = mask_ref[...] if has_mask else None  # single hoisted load

    def head3(x2, h):                           # (R, *) row slab -> (Bt, S, hd) for head h
        return x2[:, h * hd:(h + 1) * hd].reshape(Bt, S, hd)

    ctx_heads = []
    for h in range(nhead):                      # static, tiny; no broadcasts/stacks inside
        qh = head3(qk[:, :D], h)                # already scaled by 1/sqrt(hd)
        kh = head3(qk[:, D:], h)
        vh = head3(v_rows, h)

        s = jax.lax.dot_general(                # 'bqd,bkd->bqk' : (Bt, S, S)
            qh, kh, (((2,), (2,)), ((0,), (0,))),
            preferred_element_type=jnp.float32)
        if has_mask:
            s = s + mask                        # additive (S,S) mask, broadcast over batch
        s = s - jnp.max(s, axis=-1, keepdims=True)
        e = jnp.exp(s)
        p = e * pl.reciprocal(jnp.sum(e, axis=-1, keepdims=True), approx=True)

        ctx_heads.append(jax.lax.dot_general(   # (Bt, S, hd)
            p, vh, (((2,), (1,)), ((0,), (0,))),
            preferred_element_type=jnp.float32))

    # concat(heads) along lanes -> one (R, D)@(D, D) output projection
    ctx_rows = jnp.concatenate(ctx_heads, axis=-1).reshape(R, D)
    attn = jnp.dot(ctx_rows, wo_ref[...], preferred_element_type=jnp.float32) + bo_ref[...]

    # residual + norm1 (InstanceNorm1d on (B,S,D) == per-row norm over D, no affine)
    x = src_rows + attn
    mu = jnp.mean(x, axis=-1, keepdims=True)
    var = jnp.mean(x * x, axis=-1, keepdims=True) - mu * mu
    xn = (x - mu) * jax.lax.rsqrt(var + EPS)

    # feed-forward: linear1 -> exact-erf GELU -> linear2, over all Bt*S rows at once
    h1 = jnp.dot(xn, w1_ref[...], preferred_element_type=jnp.float32) + b1_ref[...]
    h1 = 0.5 * h1 * (1.0 + jax.lax.erf(h1 * INV_SQRT2))
    y = jnp.dot(h1, w2_ref[...], preferred_element_type=jnp.float32) + b2_ref[...]

    # residual + norm2
    x2 = xn + y
    mu2 = jnp.mean(x2, axis=-1, keepdims=True)
    var2 = jnp.mean(x2 * x2, axis=-1, keepdims=True) - mu2 * mu2
    out = (x2 - mu2) * jax.lax.rsqrt(var2 + EPS)
    out_ref[...] = out.reshape(Bt, S, D)


# ------------------------------ wrapper --------------------------------------
def tree_encoder_layer(src, pos_ids, params, src_mask=None, *, nhead,
                       batch_block=None):
    """src: (B, S, D) float32; pos_ids: (S,) or (B, S) int32.

    batch_block: batch elements per grid step. Default = B (single grid step:
    fine for 1-TensorCore chips, v5e/v6e, at small sizes). On v7x pass
    batch_block <= B//2 so the "parallel" grid axis has >= 2 steps and both
    TensorCores get work; at production sizes also shrink batch_block so
    2 * 3 * batch_block*S*D*4 bytes of pipelined slabs + resident weights fit
    the VMEM budget (64 MiB/TC on v7x), and use nb > 1 so input/output DMA of
    step i±1 overlaps compute of step i.
    """
    B, S, D = src.shape
    FF = params["w1_t"].shape[1]
    assert D % nhead == 0
    hd = D // nhead

    if batch_block is None:
        batch_block = B
    assert B % batch_block == 0
    nb = B // batch_block

    if pos_ids.ndim == 1:                       # mirrors unsqueeze(0).expand(sz, -1)
        pos_ids = jnp.broadcast_to(pos_ids[None, :], (B, S))
    pos_emb = params["w_pos"][pos_ids].astype(jnp.float32)   # embedding gather (glue)

    # ---- one-time host-side weight re-layout: Q/K fused, scale folded into Q ----
    scale = 1.0 / (hd ** 0.5)
    wqk = jnp.concatenate([params["wq_t"] * scale, params["wk_t"]], axis=1)   # (D, 2D)
    bqk = jnp.concatenate([params["bq"] * scale, params["bk"]], axis=1)       # (1, 2D)

    has_mask = src_mask is not None
    kernel = functools.partial(_tree_encoder_kernel, nhead=nhead, has_mask=has_mask)

    def _full(shape):
        zeros = (0,) * len(shape)
        return pl.BlockSpec(shape, lambda i, z=zeros: z)

    in_specs = [
        pl.BlockSpec((batch_block, S, D), lambda i: (i, 0, 0)),   # src
        pl.BlockSpec((batch_block, S, D), lambda i: (i, 0, 0)),   # pos_emb
    ]
    args = [src, pos_emb]
    if has_mask:
        in_specs.append(_full((S, S)))
        args.append(src_mask.astype(jnp.float32))
    in_specs += [
        _full((D, 2 * D)), _full((1, 2 * D)),    # fused Wqk (Q half pre-scaled), bqk
        _full((D, D)),     _full((1, D)),        # Wv, bv
        _full((D, D)),     _full((1, D)),        # Wo, bo
        _full((D, FF)),    _full((1, FF)),       # W1, b1
        _full((FF, D)),    _full((1, D)),        # W2, b2
    ]
    args += [wqk, bqk, params["wv_t"], params["bv"], params["wo_t"], params["bo"],
             params["w1_t"], params["b1"], params["w2_t"], params["b2"]]

    grid_spec = pltpu.PrefetchScalarGridSpec(
        num_scalar_prefetch=0,
        grid=(nb,),
        in_specs=in_specs,
        out_specs=pl.BlockSpec((batch_block, S, D), lambda i: (i, 0, 0)),
    )

    return pl.pallas_call(
        kernel,
        out_shape=jax.ShapeDtypeStruct((B, S, D), jnp.float32),
        grid_spec=grid_spec,
        compiler_params=pltpu.CompilerParams(
            dimension_semantics=("parallel",),
            # Explicit, safe on every generation (v5e default is only 16 MiB).
            vmem_limit_bytes=32 * 1024 * 1024,
        ),
    )(*args)


# --------------------------- pure-JAX reference -------------------------------
def _inst_norm(x):
    mu = jnp.mean(x, axis=-1, keepdims=True)
    var = jnp.mean((x - mu) ** 2, axis=-1, keepdims=True)
    return (x - mu) / jnp.sqrt(var + EPS)


def reference(src, pos_ids, params, src_mask=None, *, nhead):
    B, S, D = src.shape
    hd = D // nhead
    if pos_ids.ndim == 1:
        pos_ids = jnp.broadcast_to(pos_ids[None, :], (B, S))
    pos = params["w_pos"][pos_ids]
    qk_in = src + pos
    q = (qk_in @ params["wq_t"] + params["bq"]).reshape(B, S, nhead, hd).transpose(0, 2, 1, 3)
    k = (qk_in @ params["wk_t"] + params["bk"]).reshape(B, S, nhead, hd).transpose(0, 2, 1, 3)
    v = (src   @ params["wv_t"] + params["bv"]).reshape(B, S, nhead, hd).transpose(0, 2, 1, 3)
    scores = (q @ k.transpose(0, 1, 3, 2)) / jnp.sqrt(hd).astype(jnp.float32)
    if src_mask is not None:
        scores = scores + src_mask[None, None, :, :]
    p = jax.nn.softmax(scores, axis=-1)
    attn = (p @ v).transpose(0, 2, 1, 3).reshape(B, S, D)
    src2 = attn @ params["wo_t"] + params["bo"]
    x = _inst_norm(src + src2)
    h = jax.nn.gelu(x @ params["w1_t"] + params["b1"], approximate=False)
    y = h @ params["w2_t"] + params["b2"]
    return _inst_norm(x + y)


# ------------------------------- main -----------------------------------------
if __name__ == "__main__":
    d_model, nhead, dim_feedforward, max_role_count = 32, 4, 64, 8
    B, S = 2, 8

    key = jax.random.PRNGKey(0)
    ks = jax.random.split(key, 14)
    nrm = lambda k, shape: (0.1 * jax.random.normal(k, shape)).astype(jnp.float32)

    # Weights stored pre-transposed to (in_dim, out_dim) so y = x @ W + b.
    params = {
        "wq_t": nrm(ks[0], (d_model, d_model)), "bq": nrm(ks[1], (1, d_model)),
        "wk_t": nrm(ks[2], (d_model, d_model)), "bk": nrm(ks[3], (1, d_model)),
        "wv_t": nrm(ks[4], (d_model, d_model)), "bv": nrm(ks[5], (1, d_model)),
        "wo_t": nrm(ks[6], (d_model, d_model)), "bo": nrm(ks[7], (1, d_model)),
        "w1_t": nrm(ks[8], (d_model, dim_feedforward)), "b1": nrm(ks[9], (1, dim_feedforward)),
        "w2_t": nrm(ks[10], (dim_feedforward, d_model)), "b2": nrm(ks[11], (1, d_model)),
        "w_pos": nrm(ks[12], (max_role_count, d_model)),
    }

    src = jax.random.normal(ks[13], (B, S, d_model), dtype=jnp.float32)
    pos_ids = (jnp.arange(S, dtype=jnp.int32) % max_role_count)   # 1-D -> expanded inside

    # ---- no-mask path ----
    out = tree_encoder_layer(src, pos_ids, params, src_mask=None, nhead=nhead)
    out = jax.block_until_ready(out)
    ref = reference(src, pos_ids, params, None, nhead=nhead)
    assert out.shape == (B, S, d_model) and out.dtype == jnp.float32
    # tolerance 2e-3 leaves headroom for the approx (EUP) softmax reciprocal
    assert jnp.allclose(out, ref, atol=2e-3, rtol=2e-3), (
        f"no-mask max abs err {jnp.max(jnp.abs(out - ref))}")

    # ---- masked path (banded additive mask; every row keeps valid entries) ----
    idx = jnp.arange(S)
    band = jnp.abs(idx[:, None] - idx[None, :]) <= 3
    src_mask = jnp.where(band, 0.0, -1e9).astype(jnp.float32)
    out_m = tree_encoder_layer(src, pos_ids, params, src_mask=src_mask, nhead=nhead)
    out_m = jax.block_until_ready(out_m)
    ref_m = reference(src, pos_ids, params, src_mask, nhead=nhead)
    assert jnp.allclose(out_m, ref_m, atol=2e-3, rtol=2e-3), (
        f"masked max abs err {jnp.max(jnp.abs(out_m - ref_m))}")

    print("KERNEL_OK")
</pallas_src>

<mosaic_0001>
module attributes {stable_mosaic.version = 11 : i64} {
  func.func @_tree_encoder_kernel(%arg0: i32, %arg1: memref<2x8x32xf32, #tpu.memory_space<vmem>>, %arg2: memref<2x8x32xf32, #tpu.memory_space<vmem>>, %arg3: memref<32x64xf32, #tpu.memory_space<vmem>>, %arg4: memref<1x64xf32, #tpu.memory_space<vmem>>, %arg5: memref<32x32xf32, #tpu.memory_space<vmem>>, %arg6: memref<1x32xf32, #tpu.memory_space<vmem>>, %arg7: memref<32x32xf32, #tpu.memory_space<vmem>>, %arg8: memref<1x32xf32, #tpu.memory_space<vmem>>, %arg9: memref<32x64xf32, #tpu.memory_space<vmem>>, %arg10: memref<1x64xf32, #tpu.memory_space<vmem>>, %arg11: memref<64x32xf32, #tpu.memory_space<vmem>>, %arg12: memref<1x32xf32, #tpu.memory_space<vmem>>, %arg13: memref<2x8x32xf32, #tpu.memory_space<vmem>>) attributes {dimension_semantics = [#tpu.dimension_semantics<parallel>], iteration_bounds = array<i64: 1>, scalar_prefetch = 0 : i64, scratch_operands = 0 : i64, tpu.core_type = #tpu.core_type<tc>, window_params = [{transform_indices = @transform_0, window_bounds = array<i64: 2, 8, 32>}, {transform_indices = @transform_1, window_bounds = array<i64: 2, 8, 32>}, {pipeline_mode = #tpu.pipeline_mode<synchronous>, transform_indices = @transform_2, window_bounds = array<i64: 32, 64>}, {pipeline_mode = #tpu.pipeline_mode<synchronous>, transform_indices = @transform_3, window_bounds = array<i64: 1, 64>}, {pipeline_mode = #tpu.pipeline_mode<synchronous>, transform_indices = @transform_4, window_bounds = array<i64: 32, 32>}, {pipeline_mode = #tpu.pipeline_mode<synchronous>, transform_indices = @transform_5, window_bounds = array<i64: 1, 32>}, {pipeline_mode = #tpu.pipeline_mode<synchronous>, transform_indices = @transform_6, window_bounds = array<i64: 32, 32>}, {pipeline_mode = #tpu.pipeline_mode<synchronous>, transform_indices = @transform_7, window_bounds = array<i64: 1, 32>}, {pipeline_mode = #tpu.pipeline_mode<synchronous>, transform_indices = @transform_8, window_bounds = array<i64: 32, 64>}, {pipeline_mode = #tpu.pipeline_mode<synchronous>, transform_indices = @transform_9, window_bounds = array<i64: 1, 64>}, {pipeline_mode = #tpu.pipeline_mode<synchronous>, transform_indices = @transform_10, window_bounds = array<i64: 64, 32>}, {pipeline_mode = #tpu.pipeline_mode<synchronous>, transform_indices = @transform_11, window_bounds = array<i64: 1, 32>}, {transform_indices = @transform_12, window_bounds = array<i64: 2, 8, 32>}]} {
    %c0 = arith.constant 0 : index
    %c0_0 = arith.constant 0 : index
    %c0_1 = arith.constant 0 : index
    %0 = vector.load %arg1[%c0, %c0_0, %c0_1] : memref<2x8x32xf32, #tpu.memory_space<vmem>>, vector<2x8x32xf32>
    %c0_2 = arith.constant 0 : index
    %c0_3 = arith.constant 0 : index
    %c0_4 = arith.constant 0 : index
    %1 = vector.load %arg2[%c0_2, %c0_3, %c0_4] : memref<2x8x32xf32, #tpu.memory_space<vmem>>, vector<2x8x32xf32>
    %2 = vector.shape_cast %0 : vector<2x8x32xf32> to vector<16x32xf32>
    %3 = vector.shape_cast %1 : vector<2x8x32xf32> to vector<16x32xf32>
    %4 = arith.addf %2, %3 : vector<16x32xf32>
    %c0_5 = arith.constant 0 : index
    %c0_6 = arith.constant 0 : index
    %5 = vector.load %arg3[%c0_5, %c0_6] : memref<32x64xf32, #tpu.memory_space<vmem>>, vector<32x64xf32>
    %cst = arith.constant dense<0.000000e+00> : vector<16x64xf32>
    %6 = tpu.matmul %4, %5, %cst {dimension_numbers = #tpu.dot_dimension_numbers<[1], [0], [0], [1], [0, 0, 1, 1], [], []>} : vector<16x32xf32>, vector<32x64xf32>, vector<16x64xf32> -> vector<16x64xf32>
    %c0_7 = arith.constant 0 : index
    %c0_8 = arith.constant 0 : index
    %7 = vector.load %arg4[%c0_7, %c0_8] : memref<1x64xf32, #tpu.memory_space<vmem>>, vector<1x64xf32>
    %8 = vector.broadcast %7 : vector<1x64xf32> to vector<16x64xf32>
    %9 = arith.addf %6, %8 : vector<16x64xf32>
    %c0_9 = arith.constant 0 : index
    %c0_10 = arith.constant 0 : index
    %10 = vector.load %arg5[%c0_9, %c0_10] : memref<32x32xf32, #tpu.memory_space<vmem>>, vector<32x32xf32>
    %cst_11 = arith.constant dense<0.000000e+00> : vector<16x32xf32>
    %11 = tpu.matmul %2, %10, %cst_11 {dimension_numbers = #tpu.dot_dimension_numbers<[1], [0], [0], [1], [0, 0, 1, 1], [], []>} : vector<16x32xf32>, vector<32x32xf32>, vector<16x32xf32> -> vector<16x32xf32>
    %c0_12 = arith.constant 0 : index
    %c0_13 = arith.constant 0 : index
    %12 = vector.load %arg6[%c0_12, %c0_13] : memref<1x32xf32, #tpu.memory_space<vmem>>, vector<1x32xf32>
    %13 = vector.broadcast %12 : vector<1x32xf32> to vector<16x32xf32>
    %14 = arith.addf %11, %13 : vector<16x32xf32>
    %15 = vector.extract_strided_slice %9 {offsets = [0, 0], sizes = [16, 32], strides = [1, 1]} : vector<16x64xf32> to vector<16x32xf32>
    %16 = vector.extract_strided_slice %15 {offsets = [0, 0], sizes = [16, 8], strides = [1, 1]} : vector<16x32xf32> to vector<16x8xf32>
    %17 = vector.shape_cast %16 : vector<16x8xf32> to vector<2x8x8xf32>
    %18 = vector.extract_strided_slice %9 {offsets = [0, 32], sizes = [16, 32], strides = [1, 1]} : vector<16x64xf32> to vector<16x32xf32>
    %19 = vector.extract_strided_slice %18 {offsets = [0, 0], sizes = [16, 8], strides = [1, 1]} : vector<16x32xf32> to vector<16x8xf32>
    %20 = vector.shape_cast %19 : vector<16x8xf32> to vector<2x8x8xf32>
    %21 = vector.extract_strided_slice %14 {offsets = [0, 0], sizes = [16, 8], strides = [1, 1]} : vector<16x32xf32> to vector<16x8xf32>
    %22 = vector.shape_cast %21 : vector<16x8xf32> to vector<2x8x8xf32>
    %cst_14 = arith.constant dense<0.000000e+00> : vector<2x8x8xf32>
    %23 = tpu.matmul %17, %20, %cst_14 {dimension_numbers = #tpu.dot_dimension_numbers<[2], [2], [1], [1], [0, 0, 0, 1, 1, 1], [0], [0]>} : vector<2x8x8xf32>, vector<2x8x8xf32>, vector<2x8x8xf32> -> vector<2x8x8xf32>
    %cst_15 = arith.constant dense<0xFF800000> : vector<2x8xf32>
    %24 = vector.multi_reduction <maximumf>, %23, %cst_15 [2] : vector<2x8x8xf32> to vector<2x8xf32>
    %25 = vector.shape_cast %24 : vector<2x8xf32> to vector<2x8x1xf32>
    %26 = vector.broadcast %25 : vector<2x8x1xf32> to vector<2x8x8xf32>
    %27 = arith.subf %23, %26 : vector<2x8x8xf32>
    %28 = math.exp %27 : vector<2x8x8xf32>
    %cst_16 = arith.constant dense<0.000000e+00> : vector<2x8xf32>
    %29 = vector.multi_reduction <add>, %28, %cst_16 [2] : vector<2x8x8xf32> to vector<2x8xf32>
    %30 = vector.shape_cast %29 : vector<2x8xf32> to vector<2x8x1xf32>
    %31 = tpu.reciprocal %30 {approx = true} : vector<2x8x1xf32> -> vector<2x8x1xf32>
    %32 = vector.broadcast %31 : vector<2x8x1xf32> to vector<2x8x8xf32>
    %33 = arith.mulf %28, %32 : vector<2x8x8xf32>
    %cst_17 = arith.constant dense<0.000000e+00> : vector<2x8x8xf32>
    %34 = tpu.matmul %33, %22, %cst_17 {dimension_numbers = #tpu.dot_dimension_numbers<[2], [1], [1], [2], [0, 0, 0, 1, 1, 2], [0], [0]>} : vector<2x8x8xf32>, vector<2x8x8xf32>, vector<2x8x8xf32> -> vector<2x8x8xf32>
    %35 = vector.extract_strided_slice %9 {offsets = [0, 0], sizes = [16, 32], strides = [1, 1]} : vector<16x64xf32> to vector<16x32xf32>
    %36 = vector.extract_strided_slice %35 {offsets = [0, 8], sizes = [16, 8], strides = [1, 1]} : vector<16x32xf32> to vector<16x8xf32>
    %37 = vector.shape_cast %36 : vector<16x8xf32> to vector<2x8x8xf32>
    %38 = vector.extract_strided_slice %9 {offsets = [0, 32], sizes = [16, 32], strides = [1, 1]} : vector<16x64xf32> to vector<16x32xf32>
    %39 = vector.extract_strided_slice %38 {offsets = [0, 8], sizes = [16, 8], strides = [1, 1]} : vector<16x32xf32> to vector<16x8xf32>
    %40 = vector.shape_cast %39 : vector<16x8xf32> to vector<2x8x8xf32>
    %41 = vector.extract_strided_slice %14 {offsets = [0, 8], sizes = [16, 8], strides = [1, 1]} : vector<16x32xf32> to vector<16x8xf32>
    %42 = vector.shape_cast %41 : vector<16x8xf32> to vector<2x8x8xf32>
    %cst_18 = arith.constant dense<0.000000e+00> : vector<2x8x8xf32>
    %43 = tpu.matmul %37, %40, %cst_18 {dimension_numbers = #tpu.dot_dimension_numbers<[2], [2], [1], [1], [0, 0, 0, 1, 1, 1], [0], [0]>} : vector<2x8x8xf32>, vector<2x8x8xf32>, vector<2x8x8xf32> -> vector<2x8x8xf32>
    %cst_19 = arith.constant dense<0xFF800000> : vector<2x8xf32>
    %44 = vector.multi_reduction <maximumf>, %43, %cst_19 [2] : vector<2x8x8xf32> to vector<2x8xf32>
    %45 = vector.shape_cast %44 : vector<2x8xf32> to vector<2x8x1xf32>
    %46 = vector.broadcast %45 : vector<2x8x1xf32> to vector<2x8x8xf32>
    %47 = arith.subf %43, %46 : vector<2x8x8xf32>
    %48 = math.exp %47 : vector<2x8x8xf32>
    %cst_20 = arith.constant dense<0.000000e+00> : vector<2x8xf32>
    %49 = vector.multi_reduction <add>, %48, %cst_20 [2] : vector<2x8x8xf32> to vector<2x8xf32>
    %50 = vector.shape_cast %49 : vector<2x8xf32> to vector<2x8x1xf32>
    %51 = tpu.reciprocal %50 {approx = true} : vector<2x8x1xf32> -> vector<2x8x1xf32>
    %52 = vector.broadcast %51 : vector<2x8x1xf32> to vector<2x8x8xf32>
    %53 = arith.mulf %48, %52 : vector<2x8x8xf32>
    %cst_21 = arith.constant dense<0.000000e+00> : vector<2x8x8xf32>
    %54 = tpu.matmul %53, %42, %cst_21 {dimension_numbers = #tpu.dot_dimension_numbers<[2], [1], [1], [2], [0, 0, 0, 1, 1, 2], [0], [0]>} : vector<2x8x8xf32>, vector<2x8x8xf32>, vector<2x8x8xf32> -> vector<2x8x8xf32>
    %55 = vector.extract_strided_slice %9 {offsets = [0, 0], sizes = [16, 32], strides = [1, 1]} : vector<16x64xf32> to vector<16x32xf32>
    %56 = vector.extract_strided_slice %55 {offsets = [0, 16], sizes = [16, 8], strides = [1, 1]} : vector<16x32xf32> to vector<16x8xf32>
    %57 = vector.shape_cast %56 : vector<16x8xf32> to vector<2x8x8xf32>
    %58 = vector.extract_strided_slice %9 {offsets = [0, 32], sizes = [16, 32], strides = [1, 1]} : vector<16x64xf32> to vector<16x32xf32>
    %59 = vector.extract_strided_slice %58 {offsets = [0, 16], sizes = [16, 8], strides = [1, 1]} : vector<16x32xf32> to vector<16x8xf32>
    %60 = vector.shape_cast %59 : vector<16x8xf32> to vector<2x8x8xf32>
    %61 = vector.extract_strided_slice %14 {offsets = [0, 16], sizes = [16, 8], strides = [1, 1]} : vector<16x32xf32> to vector<16x8xf32>
    %62 = vector.shape_cast %61 : vector<16x8xf32> to vector<2x8x8xf32>
    %cst_22 = arith.constant dense<0.000000e+00> : vector<2x8x8xf32>
    %63 = tpu.matmul %57, %60, %cst_22 {dimension_numbers = #tpu.dot_dimension_numbers<[2], [2], [1], [1], [0, 0, 0, 1, 1, 1], [0], [0]>} : vector<2x8x8xf32>, vector<2x8x8xf32>, vector<2x8x8xf32> -> vector<2x8x8xf32>
    %cst_23 = arith.constant dense<0xFF800000> : vector<2x8xf32>
    %64 = vector.multi_reduction <maximumf>, %63, %cst_23 [2] : vector<2x8x8xf32> to vector<2x8xf32>
    %65 = vector.shape_cast %64 : vector<2x8xf32> to vector<2x8x1xf32>
    %66 = vector.broadcast %65 : vector<2x8x1xf32> to vector<2x8x8xf32>
    %67 = arith.subf %63, %66 : vector<2x8x8xf32>
    %68 = math.exp %67 : vector<2x8x8xf32>
    %cst_24 = arith.constant dense<0.000000e+00> : vector<2x8xf32>
    %69 = vector.multi_reduction <add>, %68, %cst_24 [2] : vector<2x8x8xf32> to vector<2x8xf32>
    %70 = vector.shape_cast %69 : vector<2x8xf32> to vector<2x8x1xf32>
    %71 = tpu.reciprocal %70 {approx = true} : vector<2x8x1xf32> -> vector<2x8x1xf32>
    %72 = vector.broadcast %71 : vector<2x8x1xf32> to vector<2x8x8xf32>
    %73 = arith.mulf %68, %72 : vector<2x8x8xf32>
    %cst_25 = arith.constant dense<0.000000e+00> : vector<2x8x8xf32>
    %74 = tpu.matmul %73, %62, %cst_25 {dimension_numbers = #tpu.dot_dimension_numbers<[2], [1], [1], [2], [0, 0, 0, 1, 1, 2], [0], [0]>} : vector<2x8x8xf32>, vector<2x8x8xf32>, vector<2x8x8xf32> -> vector<2x8x8xf32>
    %75 = vector.extract_strided_slice %9 {offsets = [0, 0], sizes = [16, 32], strides = [1, 1]} : vector<16x64xf32> to vector<16x32xf32>
    %76 = vector.extract_strided_slice %75 {offsets = [0, 24], sizes = [16, 8], strides = [1, 1]} : vector<16x32xf32> to vector<16x8xf32>
    %77 = vector.shape_cast %76 : vector<16x8xf32> to vector<2x8x8xf32>
    %78 = vector.extract_strided_slice %9 {offsets = [0, 32], sizes = [16, 32], strides = [1, 1]} : vector<16x64xf32> to vector<16x32xf32>
    %79 = vector.extract_strided_slice %78 {offsets = [0, 24], sizes = [16, 8], strides = [1, 1]} : vector<16x32xf32> to vector<16x8xf32>
    %80 = vector.shape_cast %79 : vector<16x8xf32> to vector<2x8x8xf32>
    %81 = vector.extract_strided_slice %14 {offsets = [0, 24], sizes = [16, 8], strides = [1, 1]} : vector<16x32xf32> to vector<16x8xf32>
    %82 = vector.shape_cast %81 : vector<16x8xf32> to vector<2x8x8xf32>
    %cst_26 = arith.constant dense<0.000000e+00> : vector<2x8x8xf32>
    %83 = tpu.matmul %77, %80, %cst_26 {dimension_numbers = #tpu.dot_dimension_numbers<[2], [2], [1], [1], [0, 0, 0, 1, 1, 1], [0], [0]>} : vector<2x8x8xf32>, vector<2x8x8xf32>, vector<2x8x8xf32> -> vector<2x8x8xf32>
    %cst_27 = arith.constant dense<0xFF800000> : vector<2x8xf32>
    %84 = vector.multi_reduction <maximumf>, %83, %cst_27 [2] : vector<2x8x8xf32> to vector<2x8xf32>
    %85 = vector.shape_cast %84 : vector<2x8xf32> to vector<2x8x1xf32>
    %86 = vector.broadcast %85 : vector<2x8x1xf32> to vector<2x8x8xf32>
    %87 = arith.subf %83, %86 : vector<2x8x8xf32>
    %88 = math.exp %87 : vector<2x8x8xf32>
    %cst_28 = arith.constant dense<0.000000e+00> : vector<2x8xf32>
    %89 = vector.multi_reduction <add>, %88, %cst_28 [2] : vector<2x8x8xf32> to vector<2x8xf32>
    %90 = vector.shape_cast %89 : vector<2x8xf32> to vector<2x8x1xf32>
    %91 = tpu.reciprocal %90 {approx = true} : vector<2x8x1xf32> -> vector<2x8x1xf32>
    %92 = vector.broadcast %91 : vector<2x8x1xf32> to vector<2x8x8xf32>
    %93 = arith.mulf %88, %92 : vector<2x8x8xf32>
    %cst_29 = arith.constant dense<0.000000e+00> : vector<2x8x8xf32>
    %94 = tpu.matmul %93, %82, %cst_29 {dimension_numbers = #tpu.dot_dimension_numbers<[2], [1], [1], [2], [0, 0, 0, 1, 1, 2], [0], [0]>} : vector<2x8x8xf32>, vector<2x8x8xf32>, vector<2x8x8xf32> -> vector<2x8x8xf32>
    %95 = tpu.concatenate %34, %54, %74, %94 in 2 : vector<2x8x8xf32>, vector<2x8x8xf32>, vector<2x8x8xf32>, vector<2x8x8xf32> -> vector<2x8x32xf32>
    %96 = vector.shape_cast %95 : vector<2x8x32xf32> to vector<16x32xf32>
    %c0_30 = arith.constant 0 : index
    %c0_31 = arith.constant 0 : index
    %97 = vector.load %arg7[%c0_30, %c0_31] : memref<32x32xf32, #tpu.memory_space<vmem>>, vector<32x32xf32>
    %cst_32 = arith.constant dense<0.000000e+00> : vector<16x32xf32>
    %98 = tpu.matmul %96, %97, %cst_32 {dimension_numbers = #tpu.dot_dimension_numbers<[1], [0], [0], [1], [0, 0, 1, 1], [], []>} : vector<16x32xf32>, vector<32x32xf32>, vector<16x32xf32> -> vector<16x32xf32>
    %c0_33 = arith.constant 0 : index
    %c0_34 = arith.constant 0 : index
    %99 = vector.load %arg8[%c0_33, %c0_34] : memref<1x32xf32, #tpu.memory_space<vmem>>, vector<1x32xf32>
    %100 = vector.broadcast %99 : vector<1x32xf32> to vector<16x32xf32>
    %101 = arith.addf %98, %100 : vector<16x32xf32>
    %102 = arith.addf %2, %101 : vector<16x32xf32>
    %cst_35 = arith.constant dense<0.000000e+00> : vector<16xf32>
    %103 = vector.multi_reduction <add>, %102, %cst_35 [1] : vector<16x32xf32> to vector<16xf32>
    %104 = vector.shape_cast %103 : vector<16xf32> to vector<16x1xf32>
    %cst_36 = arith.constant 3.200000e+01 : f32
    %105 = vector.broadcast %cst_36 : f32 to vector<16x1xf32>
    %106 = arith.divf %104, %105 : vector<16x1xf32>
    %107 = arith.mulf %102, %102 : vector<16x32xf32>
    %cst_37 = arith.constant dense<0.000000e+00> : vector<16xf32>
    %108 = vector.multi_reduction <add>, %107, %cst_37 [1] : vector<16x32xf32> to vector<16xf32>
    %109 = vector.shape_cast %108 : vector<16xf32> to vector<16x1xf32>
    %cst_38 = arith.constant 3.200000e+01 : f32
    %110 = vector.broadcast %cst_38 : f32 to vector<16x1xf32>
    %111 = arith.divf %109, %110 : vector<16x1xf32>
    %112 = arith.mulf %106, %106 : vector<16x1xf32>
    %113 = arith.subf %111, %112 : vector<16x1xf32>
    %114 = vector.broadcast %106 : vector<16x1xf32> to vector<16x32xf32>
    %115 = arith.subf %102, %114 : vector<16x32xf32>
    %cst_39 = arith.constant 9.99999974E-6 : f32
    %116 = vector.broadcast %cst_39 : f32 to vector<16x1xf32>
    %117 = arith.addf %113, %116 : vector<16x1xf32>
    %118 = math.rsqrt %117 : vector<16x1xf32>
    %119 = vector.broadcast %118 : vector<16x1xf32> to vector<16x32xf32>
    %120 = arith.mulf %115, %119 : vector<16x32xf32>
    %c0_40 = arith.constant 0 : index
    %c0_41 = arith.constant 0 : index
    %121 = vector.load %arg9[%c0_40, %c0_41] : memref<32x64xf32, #tpu.memory_space<vmem>>, vector<32x64xf32>
    %cst_42 = arith.constant dense<0.000000e+00> : vector<16x64xf32>
    %122 = tpu.matmul %120, %121, %cst_42 {dimension_numbers = #tpu.dot_dimension_numbers<[1], [0], [0], [1], [0, 0, 1, 1], [], []>} : vector<16x32xf32>, vector<32x64xf32>, vector<16x64xf32> -> vector<16x64xf32>
    %c0_43 = arith.constant 0 : index
    %c0_44 = arith.constant 0 : index
    %123 = vector.load %arg10[%c0_43, %c0_44] : memref<1x64xf32, #tpu.memory_space<vmem>>, vector<1x64xf32>
    %124 = vector.broadcast %123 : vector<1x64xf32> to vector<16x64xf32>
    %125 = arith.addf %122, %124 : vector<16x64xf32>
    %cst_45 = arith.constant 5.000000e-01 : f32
    %126 = vector.broadcast %cst_45 : f32 to vector<16x64xf32>
    %127 = arith.mulf %126, %125 : vector<16x64xf32>
    %cst_46 = arith.constant 0.707106769 : f32
    %128 = vector.broadcast %cst_46 : f32 to vector<16x64xf32>
    %129 = arith.mulf %125, %128 : vector<16x64xf32>
    %130 = math.erf %129 : vector<16x64xf32>
    %cst_47 = arith.constant 1.000000e+00 : f32
    %131 = vector.broadcast %cst_47 : f32 to vector<16x64xf32>
    %132 = arith.addf %131, %130 : vector<16x64xf32>
    %133 = arith.mulf %127, %132 : vector<16x64xf32>
    %c0_48 = arith.constant 0 : index
    %c0_49 = arith.constant 0 : index
    %134 = vector.load %arg11[%c0_48, %c0_49] : memref<64x32xf32, #tpu.memory_space<vmem>>, vector<64x32xf32>
    %cst_50 = arith.constant dense<0.000000e+00> : vector<16x32xf32>
    %135 = tpu.matmul %133, %134, %cst_50 {dimension_numbers = #tpu.dot_dimension_numbers<[1], [0], [0], [1], [0, 0, 1, 1], [], []>} : vector<16x64xf32>, vector<64x32xf32>, vector<16x32xf32> -> vector<16x32xf32>
    %c0_51 = arith.constant 0 : index
    %c0_52 = arith.constant 0 : index
    %136 = vector.load %arg12[%c0_51, %c0_52] : memref<1x32xf32, #tpu.memory_space<vmem>>, vector<1x32xf32>
    %137 = vector.broadcast %136 : vector<1x32xf32> to vector<16x32xf32>
    %138 = arith.addf %135, %137 : vector<16x32xf32>
    %139 = arith.addf %120, %138 : vector<16x32xf32>
    %cst_53 = arith.constant dense<0.000000e+00> : vector<16xf32>
    %140 = vector.multi_reduction <add>, %139, %cst_53 [1] : vector<16x32xf32> to vector<16xf32>
    %141 = vector.shape_cast %140 : vector<16xf32> to vector<16x1xf32>
    %cst_54 = arith.constant 3.200000e+01 : f32
    %142 = vector.broadcast %cst_54 : f32 to vector<16x1xf32>
    %143 = arith.divf %141, %142 : vector<16x1xf32>
    %144 = arith.mulf %139, %139 : vector<16x32xf32>
    %cst_55 = arith.constant dense<0.000000e+00> : vector<16xf32>
    %145 = vector.multi_reduction <add>, %144, %cst_55 [1] : vector<16x32xf32> to vector<16xf32>
    %146 = vector.shape_cast %145 : vector<16xf32> to vector<16x1xf32>
    %cst_56 = arith.constant 3.200000e+01 : f32
    %147 = vector.broadcast %cst_56 : f32 to vector<16x1xf32>
    %148 = arith.divf %146, %147 : vector<16x1xf32>
    %149 = arith.mulf %143, %143 : vector<16x1xf32>
    %150 = arith.subf %148, %149 : vector<16x1xf32>
    %151 = vector.broadcast %143 : vector<16x1xf32> to vector<16x32xf32>
    %152 = arith.subf %139, %151 : vector<16x32xf32>
    %cst_57 = arith.constant 9.99999974E-6 : f32
    %153 = vector.broadcast %cst_57 : f32 to vector<16x1xf32>
    %154 = arith.addf %150, %153 : vector<16x1xf32>
    %155 = math.rsqrt %154 : vector<16x1xf32>
    %156 = vector.broadcast %155 : vector<16x1xf32> to vector<16x32xf32>
    %157 = arith.mulf %152, %156 : vector<16x32xf32>
    %158 = vector.shape_cast %157 : vector<16x32xf32> to vector<2x8x32xf32>
    %c0_58 = arith.constant 0 : index
    %c0_59 = arith.constant 0 : index
    %c0_60 = arith.constant 0 : index
    %159 = vector.load %arg13[%c0_58, %c0_59, %c0_60] : memref<2x8x32xf32, #tpu.memory_space<vmem>>, vector<2x8x32xf32>
    tpu.vector_store %arg13[%c0_58, %c0_59, %c0_60], %158 {strides = array<i32>} : memref<2x8x32xf32, #tpu.memory_space<vmem>>, vector<2x8x32xf32>,
    return
  }
  func.func @transform_0(%arg0: i32) -> (i32, i32, i32) {
    %c0_i32 = arith.constant 0 : i32
    %c0_i32_0 = arith.constant 0 : i32
    %c0_i32_1 = arith.constant 0 : i32
    return %arg0, %c0_i32, %c0_i32_0 : i32, i32, i32
  }
  func.func @transform_1(%arg0: i32) -> (i32, i32, i32) {
    %c0_i32 = arith.constant 0 : i32
    %c0_i32_0 = arith.constant 0 : i32
    %c0_i32_1 = arith.constant 0 : i32
    return %arg0, %c0_i32, %c0_i32_0 : i32, i32, i32
  }
  func.func @transform_2(%arg0: i32) -> (i32, i32) {
    %c0_i32 = arith.constant 0 : i32
    %c0_i32_0 = arith.constant 0 : i32
    %c0_i32_1 = arith.constant 0 : i32
    return %c0_i32, %c0_i32_0 : i32, i32
  }
  func.func @transform_3(%arg0: i32) -> (i32, i32) {
    %c0_i32 = arith.constant 0 : i32
    %c0_i32_0 = arith.constant 0 : i32
    %c0_i32_1 = arith.constant 0 : i32
    return %c0_i32, %c0_i32_0 : i32, i32
  }
  func.func @transform_4(%arg0: i32) -> (i32, i32) {
    %c0_i32 = arith.constant 0 : i32
    %c0_i32_0 = arith.constant 0 : i32
    %c0_i32_1 = arith.constant 0 : i32
    return %c0_i32, %c0_i32_0 : i32, i32
  }
  func.func @transform_5(%arg0: i32) -> (i32, i32) {
    %c0_i32 = arith.constant 0 : i32
    %c0_i32_0 = arith.constant 0 : i32
    %c0_i32_1 = arith.constant 0 : i32
    return %c0_i32, %c0_i32_0 : i32, i32
  }
  func.func @transform_6(%arg0: i32) -> (i32, i32) {
    %c0_i32 = arith.constant 0 : i32
    %c0_i32_0 = arith.constant 0 : i32
    %c0_i32_1 = arith.constant 0 : i32
    return %c0_i32, %c0_i32_0 : i32, i32
  }
  func.func @transform_7(%arg0: i32) -> (i32, i32) {
    %c0_i32 = arith.constant 0 : i32
    %c0_i32_0 = arith.constant 0 : i32
    %c0_i32_1 = arith.constant 0 : i32
    return %c0_i32, %c0_i32_0 : i32, i32
  }
  func.func @transform_8(%arg0: i32) -> (i32, i32) {
    %c0_i32 = arith.constant 0 : i32
    %c0_i32_0 = arith.constant 0 : i32
    %c0_i32_1 = arith.constant 0 : i32
    return %c0_i32, %c0_i32_0 : i32, i32
  }
  func.func @transform_9(%arg0: i32) -> (i32, i32) {
    %c0_i32 = arith.constant 0 : i32
    %c0_i32_0 = arith.constant 0 : i32
    %c0_i32_1 = arith.constant 0 : i32
    return %c0_i32, %c0_i32_0 : i32, i32
  }
  func.func @transform_10(%arg0: i32) -> (i32, i32) {
    %c0_i32 = arith.constant 0 : i32
    %c0_i32_0 = arith.constant 0 : i32
    %c0_i32_1 = arith.constant 0 : i32
    return %c0_i32, %c0_i32_0 : i32, i32
  }
  func.func @transform_11(%arg0: i32) -> (i32, i32) {
    %c0_i32 = arith.constant 0 : i32
    %c0_i32_0 = arith.constant 0 : i32
    %c0_i32_1 = arith.constant 0 : i32
    return %c0_i32, %c0_i32_0 : i32, i32
  }
  func.func @transform_12(%arg0: i32) -> (i32, i32, i32) {
    %c0_i32 = arith.constant 0 : i32
    %c0_i32_0 = arith.constant 0 : i32
    %c0_i32_1 = arith.constant 0 : i32
    return %arg0, %c0_i32, %c0_i32_0 : i32, i32, i32
  }
}

</mosaic_0001>

<bundles_post_ra>
// kernel: tpu_custom_call.1
= control target key start
LH: loop header
LB: loop body
LE: loop exit
PB: predicated region body
PF: predicated region fallthrough
CT: control target
= control target key end

     0   :  { %17 = vsyncpa [#allocation3], 0  ;;  %s2848_s0 = inlined_call_operand.hbm [shape: f32[2,8,32], index: 0, kind: input, shape index: {}]   ;;  %s2849_s1 = inlined_call_operand.hbm [shape: f32[2,8,32], index: 1, kind: input, shape index: {}]   ;;  %s2850_s2 = inlined_call_operand.vmem [shape: f32[32,64], index: 2, kind: input, shape index: {}]   ;;  %s2851_s3 = inlined_call_operand.vmem [shape: f32[1,64], index: 3, kind: input, shape index: {}]   ;;  %s2852_s4 = inlined_call_operand.vmem [shape: f32[32,32], index: 4, kind: input, shape index: {}]   ;;  %s2853_s5 = inlined_call_operand.vmem [shape: f32[1,32], index: 5, kind: input, shape index: {}]   ;;  %s2854_s6 = inlined_call_operand.vmem [shape: f32[32,32], index: 6, kind: input, shape index: {}]   ;;  %s2855_s7 = inlined_call_operand.vmem [shape: f32[1,32], index: 7, kind: input, shape index: {}]   ;;  %s2856_s8 = inlined_call_operand.hbm [shape: f32[32,64], index: 8, kind: input, shape index: {}]   ;;  %s2857_s9 = inlined_call_operand.vmem [shape: f32[1,64], index: 9, kind: input, shape index: {}]   ;;  %s2858_s10 = inlined_call_operand.vmem [shape: f32[64,32], index: 10, kind: input, shape index: {}]   ;;  %s2859_s11 = inlined_call_operand.vmem [shape: f32[1,32], index: 11, kind: input, shape index: {}]   ;;  %s2860_s12 = inlined_call_operand.hbm [shape: f32[2,8,32], index: 12, kind: output, shape index: {}]  }
   0x1   :  { %18 = vsyncpa [#allocation6], 0 }
   0x2   :  { %19 = vsyncpa [#allocation4], 0  ;;  %s2448_s21 = smov [#allocation5]   ;;  %s2449_s23 = smov [#allocation2]  }
   0x3   :  { %s37_s22 = sshll.u32 %s2448_s21, 4  ;;  %s25_s24 = sshll.u32 %s2449_s23, 4  ;;  %s38_s22 = int_to_ptr.vmem [resolvable:$true] %s37_s22  ;;  %s2530_s24 = int_to_ptr.vmem [resolvable:$true] %s25_s24 }
   0x4   :  { %s2354_s27 = scalar_lea.hbm %s2849_s1, 256 }
   0x5   :  { %p2355_p0 = scmp.ne.s32.totalorder %s2849_s1, %s2354_s27  ;;  %p2358_p1 = scmp.lt.u32.totalorder %s2354_s27, %s2849_s1 }
   0x7   :  { %p2360_p2 = pnand %p2358_p1, %p2355_p0 }
   0x9   :  { %2363 = shalt.err (!%p2360_p2)
}
   0xa   :  { %s2364_s14 = scalar_lea.vmem %s38_s22, 256  ;;  %p2369_p4 = scmp.lt.s32.totalorder %s38_s22, %s38_s22 }
   0xb   :  { %p2365_p3 = scmp.ne.s32.totalorder %s38_s22, %s2364_s14  ;;  %p2370_p5 = scmp.lt.s32.totalorder %s2364_s14, %s2364_s14 }
   0xd   :  { %p2371_p6 = por %p2370_p5, %p2369_p4 }
   0xf   :  { %p2372_p7 = pnand %p2371_p6, %p2365_p3 }
  0x11   :  { %2375 = shalt.err (!%p2372_p7)
}
  0x12   :  { %s2450_s15 = smov 128   ;;  %s2451_s16 = smov 8  }
  0x13   :  { %43 = dma.hbm_to_vmem [thread:$0]  %s2849_s1, 256, %s38_s22, [#allocation6], %s2450_s15, %s2450_s15, %s2451_s16  }
  0x14   :  { %s2376_s21 = scalar_lea.hbm %s2848_s0, 256 }
  0x15   :  { %p2377_p8 = scmp.ne.s32.totalorder %s2848_s0, %s2376_s21  ;;  %p2380_p9 = scmp.lt.u32.totalorder %s2376_s21, %s2848_s0 }
  0x17   :  { %p2382_p10 = pnand %p2380_p9, %p2377_p8 }
  0x19   :  { %2385 = shalt.err (!%p2382_p10)
}
  0x1a   :  { %s2386_s28 = scalar_lea.vmem %s2530_s24, 256  ;;  %p2391_p12 = scmp.lt.s32.totalorder %s2530_s24, %s2530_s24 }
  0x1b   :  { %p2387_p11 = scmp.ne.s32.totalorder %s2530_s24, %s2386_s28  ;;  %p2392_p13 = scmp.lt.s32.totalorder %s2386_s28, %s2386_s28 }
  0x1d   :  { %p2393_p0 = por %p2392_p13, %p2391_p12 }
  0x1f   :  { %p2394_p1 = pnand %p2393_p0, %p2387_p11 }
  0x21   :  { %2397 = shalt.err (!%p2394_p1)
}
  0x22   :  { %31 = dma.hbm_to_vmem [thread:$0]  %s2848_s0, 256, %s2530_s24, [#allocation3], %s2450_s15, %s2450_s15, %s2451_s16  }
  0x23   :  { %s2452_s29 = smov [#allocation7]   ;;  %s2398_s17 = scalar_lea.hbm %s2856_s8, 512 }
  0x24   :  { %s61_s30 = sshll.u32 %s2452_s29, 4  ;;  %p2399_p2 = scmp.ne.s32.totalorder %s2856_s8, %s2398_s17  ;;  %s62_s30 = int_to_ptr.vmem [resolvable:$true] %s61_s30 }
  0x25   :  { %p2402_p3 = scmp.lt.u32.totalorder %s2398_s17, %s2856_s8 }
  0x27   :  { %p2404_p4 = pnand %p2402_p3, %p2399_p2 }
  0x29   :  { %2407 = shalt.err (!%p2404_p4)
}
  0x2a   :  { %s2408_s23 = scalar_lea.vmem %s62_s30, 512  ;;  %p2413_p6 = scmp.lt.s32.totalorder %s62_s30, %s62_s30 }
  0x2b   :  { %p2409_p5 = scmp.ne.s32.totalorder %s62_s30, %s2408_s23  ;;  %p2414_p7 = scmp.lt.s32.totalorder %s2408_s23, %s2408_s23 }
  0x2d   :  { %p2415_p8 = por %p2414_p7, %p2413_p6 }
  0x2f   :  { %p2416_p9 = pnand %p2415_p8, %p2409_p5 }
  0x31   :  { %2419 = shalt.err (!%p2416_p9)
}
  0x32   :  { %67 = dma.hbm_to_vmem [thread:$0]  %s2856_s8, 512, %s62_s30, [#allocation6], %s2450_s15, %s2450_s15, %s2451_s16  }
  0x33   :  { %2442 = dma.done.wait [#allocation3], 256  }
  0x34   :  { %2443 = vsyncadd [#allocation3], 4294967040 }
  0x35   :  { %2444 = dma.done.wait [#allocation6], 768  }
  0x36   :  { %2445 = vsyncadd [#allocation6], 4294966528  ;;  %v89_v0 = vld [vmem:[%s2850_s2] sm:$0xff]  ;;  %v90_v1 = vld [vmem:[%s2850_s2 + $0x8] sm:$0xff]  ;;  %vm100_vm0 = vcmask 261120   ;;  %v2453_v17 = vmov 0.0  }
  0x37   :  { %v91_v2 = vld [vmem:[%s2850_s2 + $0x10] sm:$0xff]  ;;  %v2245_v3 = vpack.c.bf16 %v90_v1, %v89_v0  ;;  %v92_v4 = vld [vmem:[%s2850_s2 + $0x18] sm:$0xff]  ;;  %v2594_v5 = vld [vmem:[#allocation2] sm:$0xff]  ;;  %2124 = vmatprep.subr.mxu0 %v2453_v17  ;;  %vm2454_vm1 = vmmov 0   ;;  %s2455_s23 = smov 96   ;;  %vm277_vm2 = vcmask 64512  }
  0x38   :  { %v85_v6 = vld [vmem:[#allocation5] sm:$0xff]  ;;  %v2249_v7 = vpack.c.bf16 %v92_v4, %v91_v2  ;;  %v2598_v9 = vld [vmem:[#allocation2 + $0x8] sm:$0xff]  ;;  %v86_v10 = vld [vmem:[#allocation5 + $0x8] sm:$0xff]  ;;  %2126 = vmatprep.mubr.msk.f32.mxu0 %vm2454_vm1, %v2453_v17  ;;  %s2458_s25 = smov 80   ;;  %s2459_s26 = smov 112   ;;  %vm1615_vm3 = vcmask 130048  }
  0x39   :  { %v87_v8 = vadd.f32 %v85_v6, %v2594_v5  ;;  %2246 = vmatprep.subr.bf16.mxu1 %v2245_v3  ;;  %v88_v11 = vadd.f32 %v86_v10, %v2598_v9  ;;  %v182_v12 = vld [vmem:[%s2852_s4] sm:$0xff]  ;;  %v183_v13 = vld [vmem:[%s2852_s4 + $0x8] sm:$0xff]  ;;  %v184_v14 = vld [vmem:[%s2852_s4 + $0x10] sm:$0xff]  ;;  %s2460_s27 = smov 72   ;;  %s2461_s28 = smov 104   ;;  %vm1618_vm4 = vcmask 195584  }
  0x3a   :  { %2248 = vmatpush3.bf16.msra.mxu1 %v2245_v3  ;;  %v2253_v15 = vpack.c.bf16 %v183_v13, %v182_v12  ;;  %v185_v16 = vld [vmem:[%s2852_s4 + $0x18] sm:$0xff]  ;;  %v1997_v19 = vld [vmem:[%s2851_s3] ss:$0 sm:$0xff]  ;;  %s2456_s3 = smov 88   ;;  %s2462_s1 = smov 16   ;;  %vm1863_vm5 = vcmask 523264  }
  0x3b   :  { %2110 = vmatprep.mubr.msk.f32.mxu1 %vm100_vm0, %v87_v8  ;;  %2250 = vmatprep.subr.bf16.mxu1 %v2249_v7  ;;  %v2257_v18 = vpack.c.bf16 %v185_v16, %v184_v14  ;;  %v2000_v26 = vld [vmem:[%s2853_s5] ss:$0 sm:$0xff]  ;;  %s2457_s5 = smov 120   ;;  %s2463_s18 = smov 24  }
  0x3e   :  { %2252 = vmatpush3.bf16.msra.mxu1 %v2249_v7 }
  0x3f   :  { %2254 = vmatprep.subr.bf16.mxu1 %v2253_v15 }
  0x41   :  { %2111 = vmatmul.mubr.msk.f32.vlgmr.msra.gmra.mrb[0].mxu1 %vm100_vm0, %v88_v11 }
  0x42   :  { %2121 = vmatprep.mubr.msk.f32.mxu1 %vm100_vm0, %v2594_v5  ;;  %2256 = vmatpush3.bf16.msra.mxu1 %v2253_v15 }
  0x43   :  { %2258 = vmatprep.subr.bf16.mxu1 %v2257_v18 }
  0x46   :  { %2260 = vmatpush3.bf16.msra.mxu1 %v2257_v18 }
  0x47   :  { %2129 = vmatprep.subr.mxu1 %v2453_v17 }
  0x49   :  { %2122 = vmatmul.mubr.msk.f32.vlgmr.msra.gmra.mrb[2].mxu1 %vm100_vm0, %v2598_v9 }
  0x4a   :  { %2131 = vmatprep.mubr.msk.f32.mxu1 %vm2454_vm1, %v2453_v17 }
 0x114   :  { %v2112_v20 = vpop.f32.mrb[0].mxu1 }
 0x115   :  { %v173_v21 = vpop.f32.mrb[1].mxu1  ;;  %v2630_v23 = vadd.f32 %v2112_v20, %v1997_v19 }
 0x116   :  { %v2627_v22 = vadd.f32 %v1997_v19, %v173_v21 }
 0x118   :  { %275 = vrot.lane.b32.xlu0 %v2627_v22, %s2455_s23 }
 0x11c   :  { %353 = vrot.lane.b32.xlu0 %v2630_v23, %s2455_s23  ;;  %v2123_v24 = vpop.f32.mrb[2].mxu1 }
 0x11d   :  { %v2641_v28 = vadd.f32 %v2123_v24, %v2000_v26  ;;  %v265_v29 = vpop.f32.mrb[3].mxu1 }
 0x11e   :  { %v2652_v30 = vadd.f32 %v2000_v26, %v265_v29 }
 0x18a   :  { %v276_v25 = vpop.permute.xlu0 %275 }
 0x18b   :  { %2125 = vmatpush3.xpose.msk.msra.mxu0 %vm277_vm2, %v276_v25 }
 0x18c   :  { %2134 = vmatprep.subr.mxu0 %v2453_v17 }
 0x18e   :  { %2127 = vmatmul.mubr.msk.f32.vlgmr.msra.gmra.mrb[0].mxu0 %vm277_vm2, %v2627_v22  ;;  %v354_v27 = vpop.permute.xlu0 %353 }
 0x18f   :  { %2130 = vmatpush3.xpose.msk.msra.mxu1 %vm277_vm2, %v354_v27  ;;  %2136 = vmatprep.mubr.msk.f32.mxu0 %vm2454_vm1, %v2453_v17 }
 0x190   :  { %2139 = vmatprep.subr.mxu1 %v2453_v17  ;;  %2135 = vmatpush3.msra.mxu0 %v2652_v30 }
 0x191   :  { %2144 = vmatprep.subr.mxu0 %v2453_v17 }
 0x192   :  { %2132 = vmatmul.mubr.msk.f32.vlgmr.msra.gmra.mrb[4].mxu1 %vm277_vm2, %v2630_v23 }
 0x193   :  { %2140 = vmatpush3.msra.mxu1 %v2641_v28  ;;  %2141 = vmatprep.mubr.msk.f32.mxu1 %vm2454_vm1, %v2453_v17 }
 0x194   :  { %2149 = vmatprep.subr.mxu1 %v2453_v17 }
 0x261   :  { %v348_v31 = vpop.f32.mrb[0].mxu0 }
 0x262   :  { %v2128_v32 = vpop.f32.mrb[1].mxu0  ;;  %v429_v33 = vsel %vm277_vm2, %v348_v31, -inf }
 0x263   :  { %430 = vmax.xlane.f32.xlu1 %v429_v33 }
 0x265   :  { %v425_v34 = vpop.f32.mrb[4].mxu1 }
 0x266   :  { %v2133_v35 = vpop.f32.mrb[5].mxu1  ;;  %v432_v36 = vsel %vm277_vm2, %v425_v34, -inf }
 0x267   :  { %433 = vmax.xlane.f32.xlu1 %v432_v36 }
 0x2f0   :  { %v431_v37 = vpop.xlane.xlu1 %430 }
 0x2f1   :  { %v435_v38 = vsub.f32 %v348_v31, %v431_v37 }
 0x2f3   :  { %v437_v39 = vmul.f32 1.442695, %v435_v38 }
 0x2f4   :  { %v434_v40 = vpop.xlane.xlu1 %433 }
 0x2f5   :  { %2310 = vpow2.f32 %v437_v39  ;;  %v436_v41 = vsub.f32 %v425_v34, %v434_v40 }
 0x2f7   :  { %v439_v42 = vmul.f32 1.442695, %v436_v41 }
 0x2f9   :  { %2312 = vpow2.f32 %v439_v42 }
 0x2ff   :  { %v2311_v43 = vpop.eup %2310 }
 0x300   :  { %v441_v44 = vsel %vm277_vm2, %v2311_v43, 0.0 }
 0x301   :  { %442 = vadd.xlane.f32.xlu0 %v441_v44 }
 0x303   :  { %v2313_v45 = vpop.eup %2312 }
 0x304   :  { %v444_v46 = vsel %vm277_vm2, %v2313_v45, 0.0 }
 0x305   :  { %445 = vadd.xlane.f32.xlu1 %v444_v46 }
 0x316   :  { %599 = vrot.lane.b32.xlu1 %v2627_v22, %s2456_s3 }
 0x31a   :  { %677 = vrot.lane.b32.xlu1 %v2630_v23, %s2456_s3 }
 0x31e   :  { %597 = vrot.lane.b32.xlu1 %v2627_v22, %s2457_s5 }
 0x322   :  { %675 = vrot.lane.b32.xlu1 %v2630_v23, %s2457_s5 }
 0x38e   :  { %v443_v47 = vpop.xlane.xlu0 %442 }
 0x38f   :  { %2314 = vrcp.f32 %v443_v47 }
 0x392   :  { %v446_v48 = vpop.xlane.xlu1 %445 }
 0x393   :  { %2316 = vrcp.f32 %v446_v48 }
 0x396   :  { %v600_v49 = vpop.permute.xlu1 %599 }
 0x399   :  { %v2315_v50 = vpop.eup %2314 }
 0x39a   :  { %v449_v51 = vmul.f32 %v2315_v50, %v2311_v43  ;;  %v678_v52 = vpop.permute.xlu1 %677 }
 0x39c   :  { %2137 = vmatmul.mubr.msk.f32.vlgmr.msra.gmra.mrb[2].mxu0 %vm277_vm2, %v449_v51 }
 0x39d   :  { %v2317_v53 = vpop.eup %2316  ;;  %2145 = vmatpush3.xpose.msk.msra.mxu0 %vm277_vm2, %v600_v49  ;;  %2146 = vmatprep.mubr.msk.f32.mxu0 %vm2454_vm1, %v2453_v17 }
 0x39e   :  { %v450_v54 = vmul.f32 %v2317_v53, %v2313_v45  ;;  %v598_v55 = vpop.permute.xlu1 %597  ;;  %2154 = vmatprep.subr.mxu0 %v2453_v17 }
 0x3a0   :  { %2142 = vmatmul.mubr.msk.f32.vlgmr.msra.gmra.mrb[6].mxu1 %vm277_vm2, %v450_v54  ;;  %2147 = vmatmul.mubr.msk.f32.vlgmr.msra.gmra.mrb[4].mxu0 %vm277_vm2, %v598_v55 }
 0x3a1   :  { %2150 = vmatpush3.xpose.msk.msra.mxu1 %vm277_vm2, %v678_v52  ;;  %2151 = vmatprep.mubr.msk.f32.mxu1 %vm2454_vm1, %v2453_v17 }
 0x3a2   :  { %v676_v56 = vpop.permute.xlu1 %675  ;;  %2159 = vmatprep.subr.mxu1 %v2453_v17  ;;  %2156 = vmatprep.mubr.msk.f32.mxu0 %vm2454_vm1, %v2453_v17 }
 0x3a4   :  { %2152 = vmatmul.mubr.msk.f32.vlgmr.msra.gmra.mrb[8].mxu1 %vm277_vm2, %v676_v56 }
 0x3a5   :  { %2161 = vmatprep.mubr.msk.f32.mxu1 %vm2454_vm1, %v2453_v17 }
 0x46f   :  { %v2682_v57 = vpop.f32.mrb[2].mxu0 }
 0x470   :  { %v2138_v58 = vpop.f32.mrb[3].mxu0 }
 0x473   :  { %v2684_v59 = vpop.f32.mrb[6].mxu1  ;;  %v671_v60 = vpop.f32.mrb[4].mxu0 }
 0x474   :  { %v2143_v61 = vpop.f32.mrb[7].mxu1  ;;  %v2148_v62 = vpop.f32.mrb[5].mxu0  ;;  %v753_v63 = vsel %vm277_vm2, %v671_v60, -inf }
 0x475   :  { %754 = vmax.xlane.f32.xlu0 %v753_v63 }
 0x477   :  { %v749_v0 = vpop.f32.mrb[8].mxu1 }
 0x478   :  { %v2153_v1 = vpop.f32.mrb[9].mxu1  ;;  %v756_v2 = vsel %vm277_vm2, %v749_v0, -inf }
 0x479   :  { %757 = vmax.xlane.f32.xlu1 %v756_v2 }
 0x48a   :  { %1009 = vrot.lane.b32.xlu1 %v2630_v23, %s2458_s25 }
 0x48b   :  { %776 = vrot.lane.b32.xlu0 %v2652_v30, %s2457_s5 }
 0x48f   :  { %853 = vrot.lane.b32.xlu0 %v2641_v28, %s2457_s5 }
 0x493   :  { %931 = vrot.lane.b32.xlu0 %v2627_v22, %s2458_s25 }
 0x502   :  { %v755_v3 = vpop.xlane.xlu0 %754 }
 0x503   :  { %v759_v4 = vsub.f32 %v671_v60, %v755_v3 }
 0x505   :  { %v761_v10 = vmul.f32 1.442695, %v759_v4 }
 0x506   :  { %v758_v6 = vpop.xlane.xlu1 %757  ;;  %v777_v7 = vpop.permute.xlu0 %776 }
 0x507   :  { %v760_v8 = vsub.f32 %v749_v0, %v758_v6  ;;  %2155 = vmatpush3.msra.mxu0 %v777_v7 }
 0x508   :  { %2164 = vmatprep.subr.mxu0 %v2453_v17 }
 0x509   :  { %v763_v11 = vmul.f32 1.442695, %v760_v8 }
 0x50a   :  { %v854_v12 = vpop.permute.xlu0 %853  ;;  %v1010_v26 = vpop.permute.xlu1 %1009 }
 0x50b   :  { %2318 = vpow2.f32 %v763_v11  ;;  %2160 = vmatpush3.msra.mxu1 %v854_v12 }
 0x50c   :  { %2169 = vmatprep.subr.mxu1 %v2453_v17  ;;  %2320 = vpow2.f32 %v761_v10 }
 0x50e   :  { %v932_v18 = vpop.permute.xlu0 %931 }
 0x515   :  { %v2319_v13 = vpop.eup %2318 }
 0x516   :  { %v768_v14 = vsel %vm277_vm2, %v2319_v13, 0.0  ;;  %v2321_v15 = vpop.eup %2320 }
 0x517   :  { %769 = vadd.xlane.f32.xlu0 %v768_v14  ;;  %v765_v16 = vsel %vm277_vm2, %v2321_v15, 0.0 }
 0x51b   :  { %766 = vadd.xlane.f32.xlu0 %v765_v16 }
 0x531   :  { %929 = vrot.lane.b32.xlu0 %v2627_v22, %s2459_s26 }
 0x535   :  { %1007 = vrot.lane.b32.xlu0 %v2630_v23, %s2459_s26 }
 0x5a4   :  { %v770_v19 = vpop.xlane.xlu0 %769 }
 0x5a5   :  { %2322 = vrcp.f32 %v770_v19 }
 0x5a8   :  { %v767_v20 = vpop.xlane.xlu0 %766 }
 0x5a9   :  { %2324 = vrcp.f32 %v767_v20 }
 0x5ac   :  { %v930_v24 = vpop.permute.xlu0 %929 }
 0x5af   :  { %v2323_v21 = vpop.eup %2322 }
 0x5b0   :  { %v774_v25 = vmul.f32 %v2323_v21, %v2319_v13  ;;  %v1008_v31 = vpop.permute.xlu0 %1007 }
 0x5b2   :  { %2162 = vmatmul.mubr.msk.f32.vlgmr.msra.gmra.mrb[10].mxu1 %vm277_vm2, %v774_v25 }
 0x5b3   :  { %v2325_v27 = vpop.eup %2324  ;;  %2170 = vmatpush3.xpose.msk.msra.mxu1 %vm277_vm2, %v1010_v26  ;;  %2171 = vmatprep.mubr.msk.f32.mxu1 %vm2454_vm1, %v2453_v17 }
 0x5b4   :  { %v773_v29 = vmul.f32 %v2325_v27, %v2321_v15  ;;  %2179 = vmatprep.subr.mxu1 %v2453_v17 }
 0x5b6   :  { %2157 = vmatmul.mubr.msk.f32.vlgmr.msra.gmra.mrb[6].mxu0 %vm277_vm2, %v773_v29  ;;  %2172 = vmatmul.mubr.msk.f32.vlgmr.msra.gmra.mrb[12].mxu1 %vm277_vm2, %v1008_v31 }
 0x5b7   :  { %2165 = vmatpush3.xpose.msk.msra.mxu0 %vm277_vm2, %v932_v18  ;;  %2166 = vmatprep.mubr.msk.f32.mxu0 %vm2454_vm1, %v2453_v17 }
 0x5b8   :  { %2174 = vmatprep.subr.mxu0 %v2453_v17  ;;  %2181 = vmatprep.mubr.msk.f32.mxu1 %vm2454_vm1, %v2453_v17 }
 0x5ba   :  { %2167 = vmatmul.mubr.msk.f32.vlgmr.msra.gmra.mrb[8].mxu0 %vm277_vm2, %v930_v24 }
 0x5bb   :  { %2176 = vmatprep.mubr.msk.f32.mxu0 %vm2454_vm1, %v2453_v17 }
 0x685   :  { %v2718_v32 = vpop.f32.mrb[10].mxu1 }
 0x686   :  { %v2163_v33 = vpop.f32.mrb[11].mxu1 }
 0x689   :  { %v2720_v34 = vpop.f32.mrb[6].mxu0  ;;  %v1081_v35 = vpop.f32.mrb[12].mxu1 }
 0x68a   :  { %v2158_v36 = vpop.f32.mrb[7].mxu0  ;;  %v2173_v37 = vpop.f32.mrb[13].mxu1  ;;  %v1088_v38 = vsel %vm277_vm2, %v1081_v35, -inf }
 0x68b   :  { %1089 = vmax.xlane.f32.xlu1 %v1088_v38  ;;  %v1624_v36 = vld [vmem:[%s2854_s6 + $0x18] sm:$0xff] }
 0x68d   :  { %v1003_v39 = vpop.f32.mrb[8].mxu0 }
 0x68e   :  { %v2168_v40 = vpop.f32.mrb[9].mxu0  ;;  %v1085_v41 = vsel %vm277_vm2, %v1003_v39, -inf }
 0x68f   :  { %1086 = vmax.xlane.f32.xlu0 %v1085_v41 }
 0x69c   :  { %1183 = vrot.lane.b32.xlu1 %v2641_v28, %s2459_s26 }
 0x6a0   :  { %1261 = vrot.lane.b32.xlu1 %v2627_v22, %s2460_s27 }
 0x6a4   :  { %1259 = vrot.lane.b32.xlu1 %v2627_v22, %s2461_s28 }
 0x6a5   :  { %1107 = vrot.lane.b32.xlu0 %v2652_v30, %s2459_s26 }
 0x718   :  { %v1090_v42 = vpop.xlane.xlu1 %1089 }
 0x719   :  { %v1092_v43 = vsub.f32 %v1081_v35, %v1090_v42  ;;  %v1623_v35 = vld [vmem:[%s2854_s6 + $0x10] sm:$0xff] }
 0x71a   :  { %v2265_v37 = vpack.c.bf16 %v1624_v36, %v1623_v35  ;;  %v1852_v35 = vld [vmem:[%s2858_s10 + $0x20] sm:$0xff]  ;;  %v1853_v36 = vld [vmem:[%s2858_s10 + $0x28] sm:$0xff] }
 0x71b   :  { %v1095_v44 = vmul.f32 1.442695, %v1092_v43 }
 0x71c   :  { %v1184_v45 = vpop.permute.xlu1 %1183  ;;  %v1087_v46 = vpop.xlane.xlu0 %1086 }
 0x71d   :  { %2326 = vpow2.f32 %v1095_v44  ;;  %v1091_v47 = vsub.f32 %v1003_v39, %v1087_v46  ;;  %2180 = vmatpush3.msra.mxu1 %v1184_v45 }
 0x71e   :  { %2189 = vmatprep.subr.mxu1 %v2453_v17 }
 0x71f   :  { %v1093_v48 = vmul.f32 1.442695, %v1091_v47 }
 0x720   :  { %v1108_v49 = vpop.permute.xlu0 %1107  ;;  %v1262_v61 = vpop.permute.xlu1 %1261 }
 0x721   :  { %2328 = vpow2.f32 %v1093_v48  ;;  %2175 = vmatpush3.msra.mxu0 %v1108_v49 }
 0x722   :  { %2184 = vmatprep.subr.mxu0 %v2453_v17 }
 0x724   :  { %v1260_v63 = vpop.permute.xlu1 %1259 }
 0x727   :  { %v2327_v22 = vpop.eup %2326 }
 0x728   :  { %v1100_v50 = vsel %vm277_vm2, %v2327_v22, 0.0 }
 0x729   :  { %1101 = vadd.xlane.f32.xlu0 %v1100_v50 }
 0x72b   :  { %v2329_v51 = vpop.eup %2328 }
 0x72c   :  { %v1097_v52 = vsel %vm277_vm2, %v2329_v51, 0.0 }
 0x72d   :  { %1098 = vadd.xlane.f32.xlu0 %v1097_v52 }
 0x743   :  { %1339 = vrot.lane.b32.xlu0 %v2630_v23, %s2460_s27 }
 0x747   :  { %1337 = vrot.lane.b32.xlu0 %v2630_v23, %s2461_s28 }
 0x7b6   :  { %v1102_v53 = vpop.xlane.xlu0 %1101 }
 0x7b7   :  { %2330 = vrcp.f32 %v1102_v53  ;;  %v2027_v53 = vld [vmem:[%s2855_s7] ss:$0 sm:$0xff] }
 0x7ba   :  { %v1099_v54 = vpop.xlane.xlu0 %1098 }
 0x7bb   :  { %2332 = vrcp.f32 %v1099_v54 }
 0x7be   :  { %v1340_v56 = vpop.permute.xlu0 %1339 }
 0x7c1   :  { %v2331_v55 = vpop.eup %2330 }
 0x7c2   :  { %v1106_v58 = vmul.f32 %v2331_v55, %v2327_v22  ;;  %v1338_v23 = vpop.permute.xlu0 %1337 }
 0x7c4   :  { %2182 = vmatmul.mubr.msk.f32.vlgmr.msra.gmra.mrb[14].mxu1 %vm277_vm2, %v1106_v58 }
 0x7c5   :  { %v2333_v60 = vpop.eup %2332  ;;  %2190 = vmatpush3.xpose.msk.msra.mxu1 %vm277_vm2, %v1340_v56  ;;  %2191 = vmatprep.mubr.msk.f32.mxu1 %vm2454_vm1, %v2453_v17 }
 0x7c6   :  { %v1105_v62 = vmul.f32 %v2333_v60, %v2329_v51  ;;  %2199 = vmatprep.subr.mxu1 %v2453_v17 }
 0x7c8   :  { %2177 = vmatmul.mubr.msk.f32.vlgmr.msra.gmra.mrb[10].mxu0 %vm277_vm2, %v1105_v62  ;;  %2192 = vmatmul.mubr.msk.f32.vlgmr.msra.gmra.mrb[16].mxu1 %vm277_vm2, %v1338_v23 }
 0x7c9   :  { %2185 = vmatpush3.xpose.msk.msra.mxu0 %vm277_vm2, %v1262_v61  ;;  %2186 = vmatprep.mubr.msk.f32.mxu0 %vm2454_vm1, %v2453_v17 }
 0x7ca   :  { %2194 = vmatprep.subr.mxu0 %v2453_v17  ;;  %2201 = vmatprep.mubr.msk.f32.mxu1 %vm2454_vm1, %v2453_v17 }
 0x7cc   :  { %2187 = vmatmul.mubr.msk.f32.vlgmr.msra.gmra.mrb[12].mxu0 %vm277_vm2, %v1260_v63 }
 0x7cd   :  { %2196 = vmatprep.mubr.msk.f32.mxu0 %vm2454_vm1, %v2453_v17 }
 0x897   :  { %v1255_v0 = vpop.f32.mrb[14].mxu1 }
 0x898   :  { %v2183_v1 = vpop.f32.mrb[15].mxu1 }
 0x899   :  { %v1746_v1 = vld [vmem:[#allocation7] sm:$0xff] }
 0x89b   :  { %v1179_v2 = vpop.f32.mrb[10].mxu0  ;;  %v1411_v3 = vpop.f32.mrb[16].mxu1 }
 0x89c   :  { %v2178_v4 = vpop.f32.mrb[11].mxu0  ;;  %v2193_v6 = vpop.f32.mrb[17].mxu1  ;;  %v1418_v7 = vsel %vm277_vm2, %v1411_v3, -inf }
 0x89d   :  { %1419 = vmax.xlane.f32.xlu0 %v1418_v7  ;;  %v1749_v4 = vld [vmem:[#allocation7 + $0x18] sm:$0xff] }
 0x89f   :  { %v1333_v8 = vpop.f32.mrb[12].mxu0 }
 0x8a0   :  { %v2188_v10 = vpop.f32.mrb[13].mxu0  ;;  %v1415_v11 = vsel %vm277_vm2, %v1333_v8, -inf }
 0x8a1   :  { %1416 = vmax.xlane.f32.xlu1 %v1415_v11 }
 0x92a   :  { %v1420_v12 = vpop.xlane.xlu0 %1419 }
 0x92b   :  { %v1422_v13 = vsub.f32 %v1411_v3, %v1420_v12  ;;  %v1748_v3 = vld [vmem:[#allocation7 + $0x10] sm:$0xff] }
 0x92d   :  { %v1425_v14 = vmul.f32 1.442695, %v1422_v13 }
 0x92e   :  { %v1417_v15 = vpop.xlane.xlu1 %1416 }
 0x92f   :  { %2334 = vpow2.f32 %v1425_v14  ;;  %v1421_v17 = vsub.f32 %v1333_v8, %v1417_v15 }
 0x931   :  { %v1423_v16 = vmul.f32 1.442695, %v1421_v17 }
 0x933   :  { %2336 = vpow2.f32 %v1423_v16 }
 0x939   :  { %v2335_v18 = vpop.eup %2334 }
 0x93a   :  { %v1430_v19 = vsel %vm277_vm2, %v2335_v18, 0.0 }
 0x93b   :  { %1431 = vadd.xlane.f32.xlu1 %v1430_v19 }
 0x93d   :  { %v2337_v20 = vpop.eup %2336 }
 0x93e   :  { %v1427_v21 = vsel %vm277_vm2, %v2337_v20, 0.0 }
 0x93f   :  { %1428 = vadd.xlane.f32.xlu0 %v1427_v21 }
 0x94c   :  { %1513 = vrot.lane.b32.xlu1 %v2641_v28, %s2461_s28 }
 0x950   :  { %1591 = vrot.lane.b32.xlu1 %v2720_v34, %s2451_s16 }
 0x954   :  { %1599 = vrot.lane.b32.xlu1 %v1179_v2, %s2462_s1  ;;  %v1747_v2 = vld [vmem:[#allocation7 + $0x8] sm:$0xff] }
 0x955   :  { %1437 = vrot.lane.b32.xlu0 %v2652_v30, %s2461_s28  ;;  %v1621_v30 = vld [vmem:[%s2854_s6] sm:$0xff] }
 0x959   :  { %1593 = vrot.lane.b32.xlu0 %v2718_v32, %s2451_s16  ;;  %v1622_v32 = vld [vmem:[%s2854_s6 + $0x8] sm:$0xff] }
 0x95a   :  { %v2261_v34 = vpack.c.bf16 %v1622_v32, %v1621_v30  ;;  %v1850_v30 = vld [vmem:[%s2858_s10 + $0x10] sm:$0xff]  ;;  %v1851_v32 = vld [vmem:[%s2858_s10 + $0x18] sm:$0xff] }
 0x95d   :  { %1601 = vrot.lane.b32.xlu0 %v1255_v0, %s2462_s1 }
 0x9c8   :  { %v1432_v24 = vpop.xlane.xlu1 %1431 }
 0x9c9   :  { %2338 = vrcp.f32 %v1432_v24 }
 0x9cc   :  { %v1429_v25 = vpop.xlane.xlu0 %1428  ;;  %v1514_v26 = vpop.permute.xlu1 %1513 }
 0x9cd   :  { %2340 = vrcp.f32 %v1429_v25  ;;  %2200 = vmatpush3.msra.mxu1 %v1514_v26 }
 0x9d0   :  { %v1438_v27 = vpop.permute.xlu0 %1437  ;;  %v1592_v43 = vpop.permute.xlu1 %1591 }
 0x9d1   :  { %2195 = vmatpush3.msra.mxu0 %v1438_v27  ;;  %v1613_v46 = vsel %vm277_vm2, %v2682_v57, %v1592_v43 }
 0x9d2   :  { %2262 = vmatprep.subr.bf16.mxu0 %v2261_v34 }
 0x9d3   :  { %v2339_v28 = vpop.eup %2338 }
 0x9d4   :  { %v1436_v29 = vmul.f32 %v2339_v28, %v2335_v18  ;;  %v1594_v42 = vpop.permute.xlu0 %1593  ;;  %v1600_v45 = vpop.permute.xlu1 %1599 }
 0x9d5   :  { %v1614_v48 = vsel %vm277_vm2, %v2684_v59, %v1594_v42  ;;  %v1616_v49 = vsel %vm1615_vm3, %v1613_v46, %v1600_v45 }
 0x9d6   :  { %2202 = vmatmul.mubr.msk.f32.vlgmr.msra.gmra.mrb[18].mxu1 %vm277_vm2, %v1436_v29  ;;  %v1848_v29 = vld [vmem:[%s2858_s10] sm:$0xff] }
 0x9d7   :  { %v2341_v31 = vpop.eup %2340 }
 0x9d8   :  { %v1435_v33 = vmul.f32 %v2341_v31, %v2337_v20  ;;  %v1602_v44 = vpop.permute.xlu0 %1601  ;;  %v1849_v31 = vld [vmem:[%s2858_s10 + $0x8] sm:$0xff] }
 0x9d9   :  { %v1617_v50 = vsel %vm1615_vm3, %v1614_v48, %v1602_v44 }
 0x9da   :  { %2197 = vmatmul.mubr.msk.f32.vlgmr.msra.gmra.mrb[14].mxu0 %vm277_vm2, %v1435_v33  ;;  %v2277_v33 = vpack.c.bf16 %v1849_v31, %v1848_v29 }
 0x9db   :  { %2264 = vmatpush3.bf16.msra.mxu0 %v2261_v34  ;;  %v2281_v34 = vpack.c.bf16 %v1851_v32, %v1850_v30 }
 0x9dc   :  { %2266 = vmatprep.subr.bf16.mxu0 %v2265_v37 }
 0x9df   :  { %2268 = vmatpush3.bf16.msra.mxu0 %v2265_v37  ;;  %v2285_v37 = vpack.c.bf16 %v1853_v36, %v1852_v35 }
 0x9e0   :  { %2278 = vmatprep.subr.bf16.mxu0 %v2277_v33 }
 0xaa9   :  { %v1585_v38 = vpop.f32.mrb[18].mxu1 }
 0xaaa   :  { %1609 = vrot.lane.b32.xlu0 %v1585_v38, %s2463_s18  ;;  %v2203_v39 = vpop.f32.mrb[19].mxu1  ;;  %v1854_v38 = vld [vmem:[%s2858_s10 + $0x30] sm:$0xff] }
 0xaab   :  { %v1855_v39 = vld [vmem:[%s2858_s10 + $0x38] sm:$0xff] }
 0xaad   :  { %v1509_v40 = vpop.f32.mrb[14].mxu0 }
 0xaae   :  { %1607 = vrot.lane.b32.xlu1 %v1509_v40, %s2463_s18  ;;  %v2198_v41 = vpop.f32.mrb[15].mxu0  ;;  %v2289_v40 = vpack.c.bf16 %v1855_v39, %v1854_v38 }
 0xaaf   :  { %v2030_v41 = vld [vmem:[%s2857_s9] ss:$0 sm:$0xff] }
 0xb1c   :  { %v1610_v47 = vpop.permute.xlu0 %1609 }
 0xb1d   :  { %v1620_v52 = vsel %vm1618_vm4, %v1617_v50, %v1610_v47 }
 0xb20   :  { %v1608_v22 = vpop.permute.xlu1 %1607 }
 0xb21   :  { %v1619_v51 = vsel %vm1618_vm4, %v1616_v49, %v1608_v22 }
 0xb22   :  { %2212 = vmatprep.mubr.msk.f32.mxu0 %vm100_vm0, %v1619_v51 }
 0xb23   :  { %2213 = vmatmul.mubr.msk.f32.vlgmr.msra.gmra.mrb[16].mxu0 %vm100_vm0, %v1620_v52 }
 0xb24   :  { %2280 = vmatpush3.bf16.msra.mxu0 %v2277_v33 }
 0xb25   :  { %2282 = vmatprep.subr.bf16.mxu0 %v2281_v34 }
 0xb28   :  { %2284 = vmatpush3.bf16.msra.mxu0 %v2281_v34 }
 0xb29   :  { %2286 = vmatprep.subr.bf16.mxu0 %v2285_v37 }
 0xb2c   :  { %2288 = vmatpush3.bf16.msra.mxu0 %v2285_v37 }
 0xb2d   :  { %2290 = vmatprep.subr.bf16.mxu0 %v2289_v40 }
 0xb30   :  { %2292 = vmatpush3.bf16.msra.mxu0 %v2289_v40 }
 0xbf6   :  { %v2214_v54 = vpop.f32.mrb[16].mxu0 }
 0xbf7   :  { %v1710_v57 = vadd.f32 %v2214_v54, %v2027_v53  ;;  %v1704_v55 = vpop.f32.mrb[17].mxu0 }
 0xbf8   :  { %v1705_v56 = vadd.f32 %v2027_v53, %v1704_v55 }
 0xbf9   :  { %v1714_v58 = vadd.f32 %v1710_v57, %v2598_v9  ;;  %v2269_v9 = vpack.c.bf16 %v1747_v2, %v1746_v1  ;;  %v2033_v57 = vld [vmem:[%s2859_s11] ss:$0 sm:$0xff]  ;;  %s2464_s11 = smov [#allocation8]  }
 0xbfa   :  { %v1713_v59 = vadd.f32 %v1705_v56, %v2594_v5  ;;  %v2273_v5 = vpack.c.bf16 %v1749_v4, %v1748_v3  ;;  %s1984_s8 = sshll.u32 %s2464_s11, 4  ;;  %s1985_s8 = int_to_ptr.vmem [resolvable:$true] %s1984_s8 }
 0xbfb   :  { %v1718_v60 = vsel %vm100_vm0, %v1714_v58, 0.0  ;;  %v1725_v23 = vmul.f32 %v1714_v58, %v1714_v58  ;;  %2270 = vmatprep.subr.bf16.mxu1 %v2269_v9  ;;  %s2420_s30 = scalar_lea.vmem %s1985_s8, 256  ;;  %p2425_p11 = scmp.lt.s32.totalorder %s1985_s8, %s1985_s8 }
 0xbfc   :  { %1719 = vadd.xlane.f32.xlu0 %v1718_v60  ;;  %v1715_v61 = vsel %vm100_vm0, %v1713_v59, 0.0  ;;  %v1724_v62 = vmul.f32 %v1713_v59, %v1713_v59  ;;  %2272 = vmatpush3.bf16.msra.mxu1 %v2269_v9  ;;  %p2421_p10 = scmp.ne.s32.totalorder %s1985_s8, %s2420_s30  ;;  %p2426_p12 = scmp.lt.s32.totalorder %s2420_s30, %s2420_s30 }
 0xbfd   :  { %1716 = vadd.xlane.f32.xlu1 %v1715_v61  ;;  %v1729_v0 = vsel %vm100_vm0, %v1725_v23, 0.0  ;;  %2274 = vmatprep.subr.bf16.mxu1 %v2273_v5 }
 0xbfe   :  { %v1726_v63 = vsel %vm100_vm0, %v1724_v62, 0.0  ;;  %p2427_p13 = por %p2426_p12, %p2425_p11 }
 0xc00   :  { %1727 = vadd.xlane.f32.xlu0 %v1726_v63  ;;  %2276 = vmatpush3.bf16.msra.mxu1 %v2273_v5  ;;  %p2428_p0 = pnand %p2427_p13, %p2421_p10 }
 0xc01   :  { %1730 = vadd.xlane.f32.xlu1 %v1729_v0 }
 0xc89   :  { %v1720_v6 = vpop.xlane.xlu0 %1719 }
 0xc8a   :  { %v1717_v7 = vpop.xlane.xlu1 %1716  ;;  %v1723_v8 = vmul.f32 0.03125, %v1720_v6 }
 0xc8b   :  { %v1722_v10 = vmul.f32 0.03125, %v1717_v7 }
 0xc8c   :  { %v1735_v15 = vmul.f32 %v1723_v8, %v1723_v8  ;;  %v1739_v25 = vsub.f32 %v1714_v58, %v1723_v8 }
 0xc8d   :  { %v1734_v11 = vmul.f32 %v1722_v10, %v1722_v10  ;;  %v1728_v12 = vpop.xlane.xlu0 %1727  ;;  %v1738_v21 = vsub.f32 %v1713_v59, %v1722_v10 }
 0xc8e   :  { %v1732_v13 = vmul.f32 0.03125, %v1728_v12  ;;  %v1731_v14 = vpop.xlane.xlu1 %1730 }
 0xc8f   :  { %v1733_v17 = vmul.f32 0.03125, %v1731_v14 }
 0xc90   :  { %v1736_v16 = vsub.f32 %v1732_v13, %v1734_v11 }
 0xc91   :  { %v1737_v18 = vsub.f32 %v1733_v17, %v1735_v15 }
 0xc92   :  { %v1740_v19 = vadd.f32 1e-05, %v1736_v16 }
 0xc93   :  { %v1741_v20 = vadd.f32 1e-05, %v1737_v18 }
 0xc94   :  { %2342 = vrsqrt.f32 %v1740_v19 }
 0xc95   :  { %2344 = vrsqrt.f32 %v1741_v20 }
 0xc9e   :  { %v2343_v24 = vpop.eup %2342 }
 0xc9f   :  { %v2345_v26 = vpop.eup %2344  ;;  %v1744_v27 = vmul.f32 %v2343_v24, %v1738_v21 }
 0xca0   :  { %v1745_v28 = vmul.f32 %v2345_v26, %v1739_v25 }
 0xca1   :  { %2223 = vmatprep.mubr.msk.f32.mxu1 %vm100_vm0, %v1744_v27 }
 0xca2   :  { %2224 = vmatmul.mubr.msk.f32.vlgmr.msra.gmra.mrb[20].mxu1 %vm100_vm0, %v1745_v28 }
 0xd75   :  { %v2225_v42 = vpop.f32.mrb[20].mxu1 }
 0xd76   :  { %v1835_v43 = vadd.f32 %v2225_v42, %v2030_v41  ;;  %v1829_v44 = vpop.f32.mrb[21].mxu1 }
 0xd77   :  { %v1830_v45 = vadd.f32 %v2030_v41, %v1829_v44 }
 0xd78   :  { %v1841_v46 = vmul.f32 0.70710677, %v1835_v43  ;;  %v1839_v52 = vmul.f32 0.5, %v1835_v43 }
 0xd79   :  { %v1840_v47 = vmul.f32 0.70710677, %v1830_v45  ;;  %v1838_v50 = vmul.f32 0.5, %v1830_v45 }
 0xd7a   :  { %2346 = verf.f32 %v1841_v46 }
 0xd7b   :  { %2348 = verf.f32 %v1840_v47 }
 0xd84   :  { %v2347_v48 = vpop.eup %2346 }
 0xd85   :  { %v2349_v49 = vpop.eup %2348  ;;  %v1845_v22 = vadd.f32 1.0, %v2347_v48 }
 0xd86   :  { %v1844_v51 = vadd.f32 1.0, %v2349_v49 }
 0xd87   :  { %v1847_v54 = vmul.f32 %v1845_v22, %v1839_v52 }
 0xd88   :  { %v1846_v53 = vmul.f32 %v1844_v51, %v1838_v50 }
 0xd8a   :  { %2242 = vmatprep.mubr.msk.f32.mxu0 %vm1863_vm5, %v1846_v53 }
 0xd8b   :  { %2243 = vmatmul.mubr.msk.f32.vlgmr.msra.gmra.mrb[18].mxu0 %vm1863_vm5, %v1847_v54 }
 0xe5e   :  { %v2244_v55 = vpop.f32.mrb[18].mxu0 }
 0xe5f   :  { %v1942_v56 = vadd.f32 %v2244_v55, %v2033_v57  ;;  %v1936_v58 = vpop.f32.mrb[19].mxu0 }
 0xe60   :  { %v1937_v59 = vadd.f32 %v2033_v57, %v1936_v58 }
 0xe61   :  { %v1946_v60 = vadd.f32 %v1942_v56, %v1745_v28 }
 0xe62   :  { %v1945_v61 = vadd.f32 %v1937_v59, %v1744_v27 }
 0xe63   :  { %v1950_v62 = vsel %vm100_vm0, %v1946_v60, 0.0  ;;  %v1956_v23 = vmul.f32 %v1946_v60, %v1946_v60 }
 0xe64   :  { %1951 = vadd.xlane.f32.xlu1 %v1950_v62  ;;  %v1947_v63 = vsel %vm100_vm0, %v1945_v61, 0.0  ;;  %v1955_v0 = vmul.f32 %v1945_v61, %v1945_v61 }
 0xe65   :  { %1948 = vadd.xlane.f32.xlu0 %v1947_v63  ;;  %v1960_v1 = vsel %vm100_vm0, %v1956_v23, 0.0 }
 0xe66   :  { %v1957_v2 = vsel %vm100_vm0, %v1955_v0, 0.0 }
 0xe68   :  { %1961 = vadd.xlane.f32.xlu1 %v1960_v1 }
 0xe69   :  { %1958 = vadd.xlane.f32.xlu0 %v1957_v2 }
 0xef1   :  { %v1952_v3 = vpop.xlane.xlu1 %1951 }
 0xef2   :  { %v1954_v9 = vmul.f32 0.03125, %v1952_v3  ;;  %v1949_v4 = vpop.xlane.xlu0 %1948 }
 0xef3   :  { %v1953_v5 = vmul.f32 0.03125, %v1949_v4 }
 0xef4   :  { %v1966_v7 = vmul.f32 %v1954_v9, %v1954_v9  ;;  %v1970_v16 = vsub.f32 %v1946_v60, %v1954_v9 }
 0xef5   :  { %v1962_v6 = vpop.xlane.xlu1 %1961  ;;  %v1965_v11 = vmul.f32 %v1953_v5, %v1953_v5  ;;  %v1969_v19 = vsub.f32 %v1945_v61, %v1953_v5 }
 0xef6   :  { %v1964_v8 = vmul.f32 0.03125, %v1962_v6  ;;  %v1959_v10 = vpop.xlane.xlu0 %1958 }
 0xef7   :  { %v1963_v12 = vmul.f32 0.03125, %v1959_v10 }
 0xef8   :  { %v1968_v13 = vsub.f32 %v1964_v8, %v1966_v7 }
 0xef9   :  { %v1967_v14 = vsub.f32 %v1963_v12, %v1965_v11 }
 0xefa   :  { %v1972_v15 = vadd.f32 1e-05, %v1968_v13 }
 0xefb   :  { %v1971_v17 = vadd.f32 1e-05, %v1967_v14 }
 0xefc   :  { %2350 = vrsqrt.f32 %v1972_v15 }
 0xefd   :  { %2352 = vrsqrt.f32 %v1971_v17 }
 0xf06   :  { %v2351_v18 = vpop.eup %2350 }
 0xf07   :  { %v2353_v20 = vpop.eup %2352  ;;  %v1976_v21 = vmul.f32 %v2351_v18, %v1970_v16 }
 0xf08   :  { %v1975_v24 = vmul.f32 %v2353_v20, %v1969_v19 }
 0xf09   :  { %1978 = vst.msk [vmem:[#allocation8 + $0x8] sm:$0xff] %vm100_vm0, %v1976_v21 }
 0xf0a   :  { %1977 = vst.msk [vmem:[#allocation8] sm:$0xff] %vm100_vm0, %v1975_v24 }
 0xf0b   :  { %2431 = shalt.err (!%p2428_p0)
}
 0xf0c   :  { %s2432_s18 = scalar_lea.hbm %s2860_s12, 256 }
 0xf0d   :  { %p2433_p1 = scmp.ne.s32.totalorder %s2860_s12, %s2432_s18  ;;  %p2436_p2 = scmp.lt.u32.totalorder %s2432_s18, %s2860_s12 }
 0xf0f   :  { %p2438_p3 = pnand %p2436_p2, %p2433_p1 }
 0xf11   :  { %2441 = shalt.err (!%p2438_p3)
}
 0xf12   :  { %1990 = dma.vmem_to_hbm [thread:$0]  %s1985_s8, 256, %s2860_s12, [#allocation4], %s2450_s15, %s2450_s15, %s2451_s16  }
 0xf13   :  { %2446 = dma.done.wait [#allocation4], 256  }
 0xf14   :  { %2447 = vsyncadd [#allocation4], 4294967040 }
 0xf15   :  { %1994 = vsyncpa [#allocation3], 1 }
 0xf16   :  { %1995 = vsyncpa [#allocation6], 1 }
 0xf17   :  { %1996 = vsyncpa [#allocation4], 1 }

</bundles_post_ra>
